<compile_context>
chip_gen: v7x
topology: tpu7x:2x2x1
jax: 0.10.0
libtpu: 0.0.40
codegen_flags: <defaults>
</compile_context>

<pallas_src>
import functools

import jax
import jax.numpy as jnp
from jax.experimental import pallas as pl
from jax.experimental.pallas import tpu as pltpu


def _round_up(n, m):
    return ((n + m - 1) // m) * m


def _divisors(n):
    out = []
    i = 1
    while i * i <= n:
        if n % i == 0:
            out.append(i)
            if i != n // i:
                out.append(n // i)
        i += 1
    return sorted(out)


def _vmem_capacity_bytes():
    try:
        return int(pltpu.get_tpu_info().vmem_capacity_bytes)
    except Exception:
        return 64 * 1024 * 1024          # assume the smallest (v7x) if unknown


def _choose_spatial_tile(S, w, per_pos_bytes, tile_budget_bytes, total_batch):
    """Spatial tile TS: divides S, multiple of w (softmax groups stay whole),
    lane-dense (TS % 128 == 0) unless it is the full spatial extent."""
    cands = sorted(t for t in _divisors(S)
                   if t % w == 0 and (t % 128 == 0 or t == S))
    cap = max(1, tile_budget_bytes // max(1, per_pos_bytes))
    soft_cap = min(cap, 8192)            # keep some pipeline depth
    fitting = [t for t in cands if t <= soft_cap]
    if not fitting:
        # TODO(synk): masked tail tiles (pl.when on the last step) would allow
        # non-divisor tiling; fall back to the smallest legal tile instead of
        # asserting so awkward shapes still run.
        return cands[0]
    # Prefer enough grid steps so both TensorCores on dual-TC chips get work.
    parallel = [t for t in fitting if total_batch * (S // t) >= 4]
    pool = parallel if parallel else fitting
    return max(pool)


def _self_attn_kernel(x_ref, wf_ref, bf_ref, out_ref, sx_ref, ksup_ref, *,
                      C, C8, w, mxu_dtype):
    # Fused MXU pass for all four 1x1x1 conv projections, computed directly in
    # the native (channels, spatial) orientation of the tile.
    xt = x_ref[...]                                            # (C, TS)
    proj = jnp.dot(wf_ref[...], xt.astype(mxu_dtype),
                   preferred_element_type=jnp.float32)
    proj = proj + bf_ref[...]                                  # (rows, TS) f32

    q = proj[0:C, :]                     # `scale` already folded into q rows
    k = proj[C8:C8 + C, :]
    v = proj[2 * C8:2 * C8 + C, :]
    sx = proj[3 * C8:3 * C8 + 1, :]      # (1, TS) pre-sigmoid foreground logit

    # Secondary outputs: k_sup is a full (C, TS) write (~1/3 of HBM writes),
    # sx is lane-dense (1, TS).  Store right away to shorten live f32 ranges.
    ksup_ref[...] = k.astype(ksup_ref.dtype)
    sx_ref[...] = sx.astype(sx_ref.dtype)

    prob_fg = jax.nn.sigmoid(sx)         # EUP; broadcasts over channels
    energy = (k * q) * prob_fg           # == (k * prob_fg) * q * scale, f32

    # Softmax over the w axis: spatial positions come in contiguous groups of
    # w along the lane axis.  One XLU transpose makes the group reduce a
    # sublane reduce (fast path needs w % 8 == 0; other w still lower
    # correctly, just with a relayout).
    ts = energy.shape[-1]
    e = energy.T.reshape(ts // w, w, C)
    m = jnp.max(e, axis=1, keepdims=True)
    p = jnp.exp(e - m)
    inv = pl.reciprocal(jnp.sum(p, axis=1, keepdims=True), approx=True)
    attn = (p * inv).reshape(ts, C).T    # back to (C, TS)

    out_ref[...] = (attn * v).astype(out_ref.dtype)


def self_attention_3d(x, params, heads, mxu_dtype=None):
    """x: (bs, C, d, h, w) NCDHW (PyTorch layout).  Returns (out, sx, k_sup).

    Outputs follow x.dtype; keep the surrounding model in bf16 end-to-end to
    halve the HBM traffic of this memory-bound kernel.  mxu_dtype can be set
    to jnp.bfloat16 to force a single-pass MXU on v5e when x is f32.
    """
    bs, C, d, h, w = x.shape
    assert C % heads == 0, "in_channels should be divisible by number of heads"
    scale = (C // heads) ** (-0.5)
    if mxu_dtype is None:
        mxu_dtype = x.dtype

    S = d * h * w
    xr = x.reshape(bs, C, S)             # free reshape; layout unchanged

    # ---- host-side fused projection weights (one-time, tiny) --------------
    # Rows: [ scale*Wq | pad to 8 | Wk | pad | Wv | pad | Wp | pad ]
    C8 = _round_up(C, 8)
    n_rows = 3 * C8 + 8
    w_dtype = params["wq"].dtype
    wf = jnp.zeros((n_rows, C), w_dtype)
    wf = wf.at[0:C].set(params["wq"] * scale)
    wf = wf.at[C8:C8 + C].set(params["wk"])
    wf = wf.at[2 * C8:2 * C8 + C].set(params["wv"])
    wf = wf.at[3 * C8:3 * C8 + 1].set(params["wp"])
    wf = wf.astype(mxu_dtype)

    bf = jnp.zeros((n_rows, 1), jnp.float32)
    bf = bf.at[0:C, 0].set(params["bq"].reshape(-1) * scale)
    bf = bf.at[C8:C8 + C, 0].set(params["bk"].reshape(-1))
    bf = bf.at[2 * C8:2 * C8 + C, 0].set(params["bv"].reshape(-1))
    bf = bf.at[3 * C8, 0].set(params["bp"].reshape(-1)[0])

    # ---- tile selection with an explicit VMEM budget -----------------------
    itemsize = jnp.dtype(x.dtype).itemsize
    per_pos = (2 * C * itemsize          # x block, double-buffered
               + 4 * C * itemsize        # out + k_sup blocks, double-buffered
               + 2 * itemsize            # sx block, double-buffered
               + n_rows * 4              # f32 proj intermediate
               + 6 * C * 4)              # f32 energy / softmax / transpose temps
    vmem_cap = _vmem_capacity_bytes()    # 64 MiB v7x, 128 MiB v5e/v6e
    tile_budget = max(2 << 20, int(vmem_cap * 0.35))
    TS = _choose_spatial_tile(S, w, per_pos, tile_budget, bs)
    n_tiles = S // TS
    vmem_limit = int(min(vmem_cap * 0.625, 96 * 1024 * 1024))

    def row_block(chan):
        return pl.BlockSpec((None, chan, TS), lambda b, t: (b, 0, t))

    kernel = functools.partial(_self_attn_kernel, C=C, C8=C8, w=w,
                               mxu_dtype=mxu_dtype)

    out_flat, sx_flat, k_flat = pl.pallas_call(
        kernel,
        out_shape=(
            jax.ShapeDtypeStruct((bs, C, S), x.dtype),
            jax.ShapeDtypeStruct((bs, 1, S), x.dtype),
            jax.ShapeDtypeStruct((bs, C, S), x.dtype),
        ),
        grid=(bs, n_tiles),
        in_specs=[
            row_block(C),                                      # x (NCDHW-native)
            pl.BlockSpec((n_rows, C), lambda b, t: (0, 0)),    # fused weights
            pl.BlockSpec((n_rows, 1), lambda b, t: (0, 0)),    # fused bias
        ],
        out_specs=[row_block(C), row_block(1), row_block(C)],
        compiler_params=pltpu.CompilerParams(
            dimension_semantics=("parallel", "parallel"),
            vmem_limit_bytes=vmem_limit),
    )(xr, wf, bf)

    return (out_flat.reshape(bs, C, d, h, w),
            sx_flat.reshape(bs, 1, d, h, w),
            k_flat.reshape(bs, C, d, h, w))


def _reference(x, params, heads):
    """Pure-JAX reference mirroring the PyTorch forward."""
    bs, C, d, h, w = x.shape
    scale = (C // heads) ** (-0.5)

    def conv1(w_, b_):
        return (jnp.einsum("oc,bcdhw->bodhw", w_, x)
                + b_.reshape(1, -1, 1, 1, 1))

    sx = conv1(params["wp"], params["bp"])
    q = conv1(params["wq"], params["bq"])
    k = conv1(params["wk"], params["bk"])
    v = conv1(params["wv"], params["bv"])
    prob_fg = jax.nn.sigmoid(sx)
    energy = (k * prob_fg) * q * scale
    attn = jax.nn.softmax(energy, axis=-1)
    return attn * v, sx, k


if __name__ == "__main__":
    bs, C, d, h, w = 2, 32, 4, 4, 8
    heads = 8

    key = jax.random.PRNGKey(0)
    ks = jax.random.split(key, 10)
    x = jax.random.normal(ks[0], (bs, C, d, h, w), jnp.float32)

    # Conv3d kernel_size=1 weights collapse to (out_channels, in_channels).
    params = {
        "wq": 0.1 * jax.random.normal(ks[1], (C, C), jnp.float32),
        "bq": 0.1 * jax.random.normal(ks[2], (C,), jnp.float32),
        "wk": 0.1 * jax.random.normal(ks[3], (C, C), jnp.float32),
        "bk": 0.1 * jax.random.normal(ks[4], (C,), jnp.float32),
        "wv": 0.1 * jax.random.normal(ks[5], (C, C), jnp.float32),
        "bv": 0.1 * jax.random.normal(ks[6], (C,), jnp.float32),
        "wp": 0.1 * jax.random.normal(ks[7], (1, C), jnp.float32),
        "bp": 0.1 * jax.random.normal(ks[8], (1,), jnp.float32),
    }
    # TODO(synk): pred_class_fg / pred_class_pg exist in __init__ but are
    # never used in forward, so they are intentionally not instantiated.

    attn_fn = jax.jit(functools.partial(self_attention_3d, heads=heads))
    out, sx, k_sup = attn_fn(x, params)
    jax.block_until_ready((out, sx, k_sup))

    ref_out, ref_sx, ref_k = _reference(x, params, heads)
    assert out.shape == (bs, C, d, h, w)
    assert sx.shape == (bs, 1, d, h, w)
    assert k_sup.shape == (bs, C, d, h, w)
    # Tolerance accounts for the approximate (EUP) reciprocal in the softmax.
    assert jnp.allclose(out, ref_out, atol=1e-3, rtol=1e-3)
    assert jnp.allclose(sx, ref_sx, atol=1e-3, rtol=1e-3)
    assert jnp.allclose(k_sup, ref_k, atol=1e-3, rtol=1e-3)

    print("KERNEL_OK")
</pallas_src>

<mosaic_0001>
module attributes {stable_mosaic.version = 11 : i64} {
  func.func @_self_attn_kernel(%arg0: i32, %arg1: i32, %arg2: memref<1x32x128xf32, #tpu.memory_space<vmem>>, %arg3: memref<104x32xf32, #tpu.memory_space<vmem>>, %arg4: memref<104x1xf32, #tpu.memory_space<vmem>>, %arg5: memref<1x32x128xf32, #tpu.memory_space<vmem>>, %arg6: memref<1x1x128xf32, #tpu.memory_space<vmem>>, %arg7: memref<1x32x128xf32, #tpu.memory_space<vmem>>) attributes {dimension_semantics = [#tpu.dimension_semantics<parallel>, #tpu.dimension_semantics<parallel>], iteration_bounds = array<i64: 2, 1>, scalar_prefetch = 0 : i64, scratch_operands = 0 : i64, tpu.core_type = #tpu.core_type<tc>, window_params = [{transform_indices = @transform_0, window_bounds = array<i64: 1, 32, 128>}, {pipeline_mode = #tpu.pipeline_mode<synchronous>, transform_indices = @transform_1, window_bounds = array<i64: 104, 32>}, {pipeline_mode = #tpu.pipeline_mode<synchronous>, transform_indices = @transform_2, window_bounds = array<i64: 104, 1>}, {transform_indices = @transform_3, window_bounds = array<i64: 1, 32, 128>}, {transform_indices = @transform_4, window_bounds = array<i64: 1, 1, 128>}, {transform_indices = @transform_5, window_bounds = array<i64: 1, 32, 128>}]} {
    %c0 = arith.constant 0 : index
    %c0_0 = arith.constant 0 : index
    %c0_1 = arith.constant 0 : index
    %0 = vector.load %arg2[%c0, %c0_0, %c0_1] : memref<1x32x128xf32, #tpu.memory_space<vmem>>, vector<1x32x128xf32>
    %1 = vector.shape_cast %0 : vector<1x32x128xf32> to vector<32x128xf32>
    %c0_2 = arith.constant 0 : index
    %c0_3 = arith.constant 0 : index
    %2 = vector.load %arg3[%c0_2, %c0_3] : memref<104x32xf32, #tpu.memory_space<vmem>>, vector<104x32xf32>
    %cst = arith.constant dense<0.000000e+00> : vector<104x128xf32>
    %3 = tpu.matmul %2, %1, %cst {dimension_numbers = #tpu.dot_dimension_numbers<[1], [0], [0], [1], [0, 0, 1, 1], [], []>} : vector<104x32xf32>, vector<32x128xf32>, vector<104x128xf32> -> vector<104x128xf32>
    %c0_4 = arith.constant 0 : index
    %c0_5 = arith.constant 0 : index
    %4 = vector.load %arg4[%c0_4, %c0_5] : memref<104x1xf32, #tpu.memory_space<vmem>>, vector<104x1xf32>
    %5 = vector.broadcast %4 : vector<104x1xf32> to vector<104x128xf32>
    %6 = arith.addf %3, %5 : vector<104x128xf32>
    %7 = vector.extract_strided_slice %6 {offsets = [0, 0], sizes = [32, 128], strides = [1, 1]} : vector<104x128xf32> to vector<32x128xf32>
    %8 = vector.extract_strided_slice %6 {offsets = [32, 0], sizes = [32, 128], strides = [1, 1]} : vector<104x128xf32> to vector<32x128xf32>
    %9 = vector.extract_strided_slice %6 {offsets = [64, 0], sizes = [32, 128], strides = [1, 1]} : vector<104x128xf32> to vector<32x128xf32>
    %10 = vector.extract_strided_slice %6 {offsets = [96, 0], sizes = [1, 128], strides = [1, 1]} : vector<104x128xf32> to vector<1x128xf32>
    %c0_6 = arith.constant 0 : index
    %c0_7 = arith.constant 0 : index
    %c0_8 = arith.constant 0 : index
    %11 = vector.load %arg7[%c0_6, %c0_7, %c0_8] : memref<1x32x128xf32, #tpu.memory_space<vmem>>, vector<1x32x128xf32>
    %12 = vector.shape_cast %11 : vector<1x32x128xf32> to vector<32x128xf32>
    %13 = vector.shape_cast %8 : vector<32x128xf32> to vector<1x32x128xf32>
    tpu.vector_store %arg7[%c0_6, %c0_7, %c0_8], %13 {strides = array<i32>} : memref<1x32x128xf32, #tpu.memory_space<vmem>>, vector<1x32x128xf32>,
    %c0_9 = arith.constant 0 : index
    %c0_10 = arith.constant 0 : index
    %c0_11 = arith.constant 0 : index
    %14 = vector.load %arg6[%c0_9, %c0_10, %c0_11] : memref<1x1x128xf32, #tpu.memory_space<vmem>>, vector<1x1x128xf32>
    %15 = vector.shape_cast %14 : vector<1x1x128xf32> to vector<1x128xf32>
    %16 = vector.shape_cast %10 : vector<1x128xf32> to vector<1x1x128xf32>
    tpu.vector_store %arg6[%c0_9, %c0_10, %c0_11], %16 {strides = array<i32>} : memref<1x1x128xf32, #tpu.memory_space<vmem>>, vector<1x1x128xf32>,
    %17 = arith.negf %10 : vector<1x128xf32>
    %18 = math.exp %17 : vector<1x128xf32>
    %cst_12 = arith.constant 1.000000e+00 : f32
    %19 = vector.broadcast %cst_12 : f32 to vector<1x128xf32>
    %20 = arith.addf %19, %18 : vector<1x128xf32>
    %21 = arith.divf %19, %20 : vector<1x128xf32>
    %22 = arith.mulf %8, %7 : vector<32x128xf32>
    %23 = vector.broadcast %21 : vector<1x128xf32> to vector<32x128xf32>
    %24 = arith.mulf %22, %23 : vector<32x128xf32>
    %25 = tpu.transpose %24, [1, 0] : vector<32x128xf32> -> vector<128x32xf32>
    %26 = vector.shape_cast %25 : vector<128x32xf32> to vector<16x8x32xf32>
    %cst_13 = arith.constant dense<0xFF800000> : vector<16x32xf32>
    %27 = vector.multi_reduction <maximumf>, %26, %cst_13 [1] : vector<16x8x32xf32> to vector<16x32xf32>
    %28 = vector.shape_cast %27 : vector<16x32xf32> to vector<16x1x32xf32>
    %29 = vector.broadcast %28 : vector<16x1x32xf32> to vector<16x8x32xf32>
    %30 = arith.subf %26, %29 : vector<16x8x32xf32>
    %31 = math.exp %30 : vector<16x8x32xf32>
    %cst_14 = arith.constant dense<0.000000e+00> : vector<16x32xf32>
    %32 = vector.multi_reduction <add>, %31, %cst_14 [1] : vector<16x8x32xf32> to vector<16x32xf32>
    %33 = vector.shape_cast %32 : vector<16x32xf32> to vector<16x1x32xf32>
    %34 = tpu.reciprocal %33 {approx = true} : vector<16x1x32xf32> -> vector<16x1x32xf32>
    %35 = vector.broadcast %34 : vector<16x1x32xf32> to vector<16x8x32xf32>
    %36 = arith.mulf %31, %35 : vector<16x8x32xf32>
    %37 = vector.shape_cast %36 : vector<16x8x32xf32> to vector<128x32xf32>
    %38 = tpu.transpose %37, [1, 0] : vector<128x32xf32> -> vector<32x128xf32>
    %39 = arith.mulf %38, %9 : vector<32x128xf32>
    %c0_15 = arith.constant 0 : index
    %c0_16 = arith.constant 0 : index
    %c0_17 = arith.constant 0 : index
    %40 = vector.load %arg5[%c0_15, %c0_16, %c0_17] : memref<1x32x128xf32, #tpu.memory_space<vmem>>, vector<1x32x128xf32>
    %41 = vector.shape_cast %40 : vector<1x32x128xf32> to vector<32x128xf32>
    %42 = vector.shape_cast %39 : vector<32x128xf32> to vector<1x32x128xf32>
    tpu.vector_store %arg5[%c0_15, %c0_16, %c0_17], %42 {strides = array<i32>} : memref<1x32x128xf32, #tpu.memory_space<vmem>>, vector<1x32x128xf32>,
    return
  }
  func.func @transform_0(%arg0: i32, %arg1: i32) -> (i32, i32, i32) {
    %c0_i32 = arith.constant 0 : i32
    %c0_i32_0 = arith.constant 0 : i32
    return %arg0, %c0_i32, %arg1 : i32, i32, i32
  }
  func.func @transform_1(%arg0: i32, %arg1: i32) -> (i32, i32) {
    %c0_i32 = arith.constant 0 : i32
    %c0_i32_0 = arith.constant 0 : i32
    %c0_i32_1 = arith.constant 0 : i32
    return %c0_i32, %c0_i32_0 : i32, i32
  }
  func.func @transform_2(%arg0: i32, %arg1: i32) -> (i32, i32) {
    %c0_i32 = arith.constant 0 : i32
    %c0_i32_0 = arith.constant 0 : i32
    %c0_i32_1 = arith.constant 0 : i32
    return %c0_i32, %c0_i32_0 : i32, i32
  }
  func.func @transform_3(%arg0: i32, %arg1: i32) -> (i32, i32, i32) {
    %c0_i32 = arith.constant 0 : i32
    %c0_i32_0 = arith.constant 0 : i32
    return %arg0, %c0_i32, %arg1 : i32, i32, i32
  }
  func.func @transform_4(%arg0: i32, %arg1: i32) -> (i32, i32, i32) {
    %c0_i32 = arith.constant 0 : i32
    %c0_i32_0 = arith.constant 0 : i32
    return %arg0, %c0_i32, %arg1 : i32, i32, i32
  }
  func.func @transform_5(%arg0: i32, %arg1: i32) -> (i32, i32, i32) {
    %c0_i32 = arith.constant 0 : i32
    %c0_i32_0 = arith.constant 0 : i32
    return %arg0, %c0_i32, %arg1 : i32, i32, i32
  }
}

</mosaic_0001>

<bundles_post_ra>
// kernel: self_attention_3d.1
= control target key start
LH: loop header
LB: loop body
LE: loop exit
PB: predicated region body
PF: predicated region fallthrough
CT: control target
= control target key end

     0   :  { %s1382_s18 = smov 0   ;;  %s1384_s19 = smov 0   ;;  %s1689_s0 = inlined_call_operand.vmem [shape: f32[2,32,128], index: 0, kind: input, shape index: {}]   ;;  %s1690_s1 = inlined_call_operand.vmem [shape: f32[104,32], index: 1, kind: input, shape index: {}]   ;;  %s1691_s2 = inlined_call_operand.vmem [shape: f32[104,1], index: 2, kind: input, shape index: {}]   ;;  %s1692_s3 = inlined_call_operand.vmem [shape: f32[2,32,128], index: 3, kind: output, shape index: {0}]   ;;  %s1693_s4 = inlined_call_operand.vmem [shape: f32[2,1,128], index: 4, kind: output, shape index: {1}]   ;;  %s1694_s5 = inlined_call_operand.vmem [shape: f32[2,32,128], index: 5, kind: output, shape index: {2}]  }
   0x1   :  { %s1386_s20 = smov 0  }
   0x2 LB: > { %s28_s21 = sadd.s32 1, %s1342_s19  ;;  %p1126_p0 = scmp.ge.s32.totalorder %s1346_s20, 1  ;;  %s1346_s20 = sphi %s1386_s20, %s16_s20   ;;  %s1342_s19 = sphi %s1384_s19, %s1696_s19   ;;  %s1338_s18 = sphi %s1382_s18, %s1695_s18  }
   0x3   : > { %p30_p1 = scmp.ge.s32.totalorder %s28_s21, 2  ;;  %p215_p2 = scmp.lt.s32.totalorder %s1346_s20, 3 }
   0x5   : > { %s1698_s21 = smov (%p30_p1, %s28_s21), 0  ;;  %p216_p3 = pnand %p1126_p0, %p215_p2 }
   0x6   : > { %p263_p4 = scmp.lt.s32.totalorder (!%p216_p3), %s1338_s18, 1  ;;  %v1348_v0 = vmov (!%p216_p3), 0.0|0.0   ;;  %vm1349_vm0 = vmmov (!%p216_p3), 0   ;;  %v1350_v1 = vmov (!%p216_p3), 0.0   ;;  %v1351_v2 = vmov (!%p216_p3), 0   ;;  %v322_v3 = vld [vmem:[%s1691_s2 + $0x60] sm:$0xff] (!%p216_p3) }
   0x7   : > { %219 = sbr.rel (%p216_p3) target bundleno = 636 (0x27c), region = 32  ;;  %1216 = vmatprep.subr.bf16.mxu0 (!%p216_p3), %v1348_v0  ;;  %1222 = vmatprep.subr.bf16.mxu1 (!%p216_p3), %v1348_v0  ;;  %v314_v9 = vld [vmem:[%s1691_s2 + $0x20] sm:$0xff] (!%p216_p3)  ;;  %v311_v12 = vld [vmem:[%s1691_s2 + $0x8] sm:$0xff] (!%p216_p3)  ;;  %vm388_vm1 = vcmask (!%p216_p3), 261120   ;;  %v304_v15 = vld [vmem:[%s1690_s1 + $0x38] sm:$0xff] (!%p216_p3) }
   0x8   : > { %1177 = vmatprep.mubr.msk.f32.mxu0 (!%p216_p3), %vm1349_vm0, %v1350_v1  ;;  %1198 = vmatprep.mubr.msk.f32.mxu1 (!%p216_p3), %vm1349_vm0, %v1350_v1  ;;  %v310_v10 = vld [vmem:[%s1691_s2] sm:$0xff] (!%p216_p3)  ;;  %v315_v13 = vld [vmem:[%s1691_s2 + $0x28] sm:$0xff] (!%p216_p3)  ;;  %v312_v16 = vld [vmem:[%s1691_s2 + $0x10] sm:$0xff] (!%p216_p3) }
   0x9   : > { %1254 = vset.pattern.permute.xlu0 (!%p216_p3), %v1351_v2  ;;  %1255 = vset.pattern.permute.xlu1 (!%p216_p3), %v1351_v2  ;;  %v297_v14 = vld [vmem:[%s1690_s1] sm:$0xff] (!%p216_p3)  ;;  %v316_v17 = vld [vmem:[%s1691_s2 + $0x30] sm:$0xff] (!%p216_p3)  ;;  %v298_v18 = vld [vmem:[%s1690_s1 + $0x8] sm:$0xff] (!%p216_p3) }
   0xa   : > { %385 = vperm.xlu0 (!%p216_p3), %1254, %v322_v3   ;;  %345 = vperm.xlu1 (!%p216_p3), %1255, %v314_v9   ;;  %v305_v19 = vld [vmem:[%s1690_s1 + $0x40] sm:$0xff] (!%p216_p3)  ;;  %v313_v20 = vld [vmem:[%s1691_s2 + $0x18] sm:$0xff] (!%p216_p3)  ;;  %v299_v22 = vld [vmem:[%s1690_s1 + $0x10] sm:$0xff] (!%p216_p3) }
   0xb   : > { %v317_v21 = vld [vmem:[%s1691_s2 + $0x38] sm:$0xff] (!%p216_p3)  ;;  %v306_v23 = vld [vmem:[%s1690_s1 + $0x48] sm:$0xff] (!%p216_p3)  ;;  %v318_v24 = vld [vmem:[%s1691_s2 + $0x40] sm:$0xff] (!%p216_p3) }
   0xc   : > { %v300_v25 = vld [vmem:[%s1690_s1 + $0x18] sm:$0xff] (!%p216_p3)  ;;  %v307_v26 = vld [vmem:[%s1690_s1 + $0x50] sm:$0xff] (!%p216_p3)  ;;  %v319_v27 = vld [vmem:[%s1691_s2 + $0x48] sm:$0xff] (!%p216_p3) }
   0xd   : > { %v301_v28 = vld [vmem:[%s1690_s1 + $0x20] sm:$0xff] (!%p216_p3)  ;;  %v308_v29 = vld [vmem:[%s1690_s1 + $0x58] sm:$0xff] (!%p216_p3)  ;;  %v320_v30 = vld [vmem:[%s1691_s2 + $0x50] sm:$0xff] (!%p216_p3) }
   0xe   : > { %s1700_s18 = smov (!%p263_p4, %s1338_s18), 1  ;;  %325 = vperm.xlu0 %1254, %v310_v10   ;;  %330 = vperm.xlu1 %1255, %v311_v12   ;;  %v302_v31 = vld [vmem:[%s1690_s1 + $0x28] sm:$0xff]  ;;  %v309_v32 = vld [vmem:[%s1690_s1 + $0x60] sm:$0xff]  ;;  %v321_v33 = vld [vmem:[%s1691_s2 + $0x58] sm:$0xff] }
   0xf   : > { %s1407_s22 = sshll.u32 %s1700_s18, 5  ;;  %v303_v34 = vld [vmem:[%s1690_s1 + $0x30] sm:$0xff]  ;;  %s284_s23 = scalar_lea.vmem %s1693_s4, %s1700_s18 }
  0x10   : > { %s270_s25 = scalar_lea.vmem %s1689_s0, %s1407_s22  ;;  %s1530_s15 = scalar_lea.vmem %s1694_s5, %s1407_s22 }
  0x11   : > { %v293_v4 = vld [vmem:[%s270_s25] sm:$0xff]  ;;  %v294_v5 = vld [vmem:[%s270_s25 + $0x8] sm:$0xff]  ;;  %v295_v6 = vld [vmem:[%s270_s25 + $0x10] sm:$0xff] }
  0x12   : > { %v1217_v7 = vpack.c.bf16 %v294_v5, %v293_v4  ;;  %v296_v8 = vld [vmem:[%s270_s25 + $0x18] sm:$0xff]  ;;  %350 = vperm.xlu0 %1254, %v315_v13   ;;  %335 = vperm.xlu1 %1255, %v312_v16   ;;  %s278_s25 = scalar_lea.vmem %s1692_s3, %s1407_s22 }
  0x13   : > { %v1220_v11 = vpack.c.bf16 %v296_v8, %v295_v6 }
  0x14   : > { %1218 = vmatpush3.bf16.msra.mxu0 %v1217_v7  ;;  %1224 = vmatpush3.bf16.msra.mxu1 %v1217_v7 }
  0x15   : > { %1219 = vmatprep.subr.bf16.mxu0 %v1348_v0  ;;  %1223 = vmatprep.subr.bf16.mxu1 %v1348_v0 }
  0x16   : > { %355 = vperm.xlu0 %1254, %v316_v17   ;;  %340 = vperm.xlu1 %1255, %v313_v20  }
  0x18   : > { %1221 = vmatpush3.bf16.msra.mxu0 %v1220_v11  ;;  %1225 = vmatpush3.bf16.msra.mxu1 %v1220_v11 }
  0x1a   : > { %360 = vperm.xlu0 %1254, %v317_v21  }
  0x1b   : > { %1178 = vmatmul.mubr.msk.f32.vlgmr.msra.gmra.mrb[0].mxu0 %vm388_vm1, %v297_v14  ;;  %1199 = vmatmul.mubr.msk.f32.vlgmr.msra.gmra.mrb[0].mxu1 %vm388_vm1, %v304_v15 }
  0x1c   : > { %1180 = vmatprep.mubr.msk.f32.mxu0 %vm1349_vm0, %v1350_v1  ;;  %1201 = vmatprep.mubr.msk.f32.mxu1 %vm1349_vm0, %v1350_v1 }
  0x1e   : > { %365 = vperm.xlu0 %1254, %v318_v24  }
  0x1f   : > { %1181 = vmatmul.mubr.msk.f32.gmra.mrb[2].mxu0 %vm388_vm1, %v298_v18  ;;  %1202 = vmatmul.mubr.msk.f32.gmra.mrb[2].mxu1 %vm388_vm1, %v305_v19 }
  0x20   : > { %1183 = vmatprep.mubr.msk.f32.mxu0 %vm1349_vm0, %v1350_v1  ;;  %1204 = vmatprep.mubr.msk.f32.mxu1 %vm1349_vm0, %v1350_v1 }
  0x22   : > { %370 = vperm.xlu0 %1254, %v319_v27  }
  0x23   : > { %1184 = vmatmul.mubr.msk.f32.gmra.mrb[4].mxu0 %vm388_vm1, %v299_v22  ;;  %1205 = vmatmul.mubr.msk.f32.gmra.mrb[4].mxu1 %vm388_vm1, %v306_v23  ;;  %v573_v22 = vlaneseq }
  0x24   : > { %1186 = vmatprep.mubr.msk.f32.mxu0 %vm1349_vm0, %v1350_v1  ;;  %1207 = vmatprep.mubr.msk.f32.mxu1 %vm1349_vm0, %v1350_v1 }
  0x25   : > { %v574_v23 = vshrl.u32 %v573_v22, 7 }
  0x26   : > { %375 = vperm.xlu0 %1254, %v320_v30  }
  0x27   : > { %1187 = vmatmul.mubr.msk.f32.gmra.mrb[6].mxu0 %vm388_vm1, %v300_v25  ;;  %1208 = vmatmul.mubr.msk.f32.gmra.mrb[6].mxu1 %vm388_vm1, %v307_v26  ;;  %v575_v24 = vsub.s32 0, %v574_v23 }
  0x28   : > { %1189 = vmatprep.mubr.msk.f32.mxu0 %vm1349_vm0, %v1350_v1  ;;  %1210 = vmatprep.mubr.msk.f32.mxu1 %vm1349_vm0, %v1350_v1 }
  0x2a   : > { %380 = vperm.xlu0 %1254, %v321_v33  }
  0x2b   : > { %1190 = vmatmul.mubr.msk.f32.gmra.mrb[8].mxu0 %vm388_vm1, %v301_v28  ;;  %1211 = vmatmul.mubr.msk.f32.gmra.mrb[8].mxu1 %vm388_vm1, %v308_v29 }
  0x2c   : > { %1192 = vmatprep.mubr.msk.f32.mxu0 %vm1349_vm0, %v1350_v1  ;;  %1213 = vmatprep.mubr.msk.f32.mxu1 %vm1349_vm0, %v1350_v1 }
  0x2f   : > { %1193 = vmatmul.mubr.msk.f32.gmra.mrb[10].mxu0 %vm388_vm1, %v302_v31  ;;  %1214 = vmatmul.mubr.msk.f32.gmra.mrb[10].mxu1 %vm388_vm1, %v309_v32 }
  0x30   : > { %1195 = vmatprep.mubr.msk.f32.mxu0 %vm1349_vm0, %v1350_v1 }
  0x33   : > { %1196 = vmatmul.mubr.msk.f32.gmra.mrb[12].mxu0 %vm388_vm1, %v303_v34 }
  0x89   : > { %v386_v35 = vpop.permute.xlu0 %385  ;;  %v346_v38 = vpop.permute.xlu1 %345 }
  0x8d   : > { %v326_v36 = vpop.permute.xlu0 %325  ;;  %v331_v40 = vpop.permute.xlu1 %330 }
  0x91   : > { %v351_v37 = vpop.permute.xlu0 %350  ;;  %v336_v47 = vpop.permute.xlu1 %335 }
  0x95   : > { %v356_v39 = vpop.permute.xlu0 %355  ;;  %v341_v56 = vpop.permute.xlu1 %340 }
  0x99   : > { %v361_v41 = vpop.permute.xlu0 %360 }
  0xee   : > { %v529_v42 = vpop.f32.mrb[0].mxu1  ;;  %v494_v43 = vpop.f32.mrb[0].mxu0 }
  0xef   : > { %v530_v44 = vadd.f32 %v529_v42, %v361_v41  ;;  %v1200_v45 = vpop.f32.mrb[1].mxu1  ;;  %v1179_v46 = vpop.f32.mrb[1].mxu0  ;;  %v495_v62 = vadd.f32 %v494_v43, %v326_v36 }
  0xf1   : > { %561 = vst [vmem:[%s1530_s15 + $0x18] sm:$0xff] %v530_v44 }
  0xf2   : > { %v1533_v48 = vpop.f32.mrb[2].mxu1  ;;  %v499_v49 = vpop.f32.mrb[2].mxu0 }
  0xf3   : > { %v1203_v50 = vpop.f32.mrb[3].mxu1  ;;  %v1182_v51 = vpop.f32.mrb[3].mxu0  ;;  %v500_v5 = vadd.f32 %v499_v49, %v331_v40 }
  0xf6   : > { %v1535_v52 = vpop.f32.mrb[4].mxu1  ;;  %v504_v53 = vpop.f32.mrb[4].mxu0 }
  0xf7   : > { %v1206_v54 = vpop.f32.mrb[5].mxu1  ;;  %v1185_v55 = vpop.f32.mrb[5].mxu0  ;;  %v505_v13 = vadd.f32 %v504_v53, %v336_v47 }
  0xfa   : > { %v509_v57 = vpop.f32.mrb[6].mxu0  ;;  %v1537_v58 = vpop.f32.mrb[6].mxu1 }
  0xfb   : > { %v510_v59 = vadd.f32 %v509_v57, %v341_v56  ;;  %v1209_v60 = vpop.f32.mrb[7].mxu1  ;;  %v1188_v61 = vpop.f32.mrb[7].mxu0 }
  0xfd   : > { %v572_v63 = vmul.f32 %v530_v44, %v510_v59 }
  0xfe   : > { %v1539_v0 = vpop.f32.mrb[8].mxu1  ;;  %v514_v1 = vpop.f32.mrb[8].mxu0 }
  0xff   : > { %v1212_v2 = vpop.f32.mrb[9].mxu1  ;;  %v515_v3 = vadd.f32 %v514_v1, %v346_v38  ;;  %v1191_v4 = vpop.f32.mrb[9].mxu0 }
 0x101   : > { %558 = vst [vmem:[%s1530_s15] sm:$0xff] %v515_v3  ;;  %v569_v6 = vmul.f32 %v515_v3, %v495_v62 }
 0x102   : > { %v519_v7 = vpop.f32.mrb[10].mxu0  ;;  %v554_v8 = vpop.f32.mrb[10].mxu1 }
 0x103   : > { %v520_v9 = vadd.f32 %v519_v7, %v351_v37  ;;  %v555_v10 = vadd.f32 %v554_v8, %v386_v35  ;;  %v1215_v11 = vpop.f32.mrb[11].mxu1  ;;  %v1194_v12 = vpop.f32.mrb[11].mxu0 }
 0x105   : > { %559 = vst [vmem:[%s1530_s15 + $0x8] sm:$0xff] %v520_v9  ;;  %v570_v14 = vmul.f32 %v520_v9, %v500_v5  ;;  %562 = vst [vmem:[%s284_s23] sm:$0x1] %v555_v10  ;;  %v1146_v15 = vmul.f32 -1.442695, %v555_v10 }
 0x106   : > { %v524_v16 = vpop.f32.mrb[12].mxu0 }
 0x107   : > { %1256 = vpow2.f32 %v1146_v15  ;;  %v525_v17 = vadd.f32 %v524_v16, %v356_v39  ;;  %v1197_v18 = vpop.f32.mrb[13].mxu0 }
 0x109   : > { %560 = vst [vmem:[%s1530_s15 + $0x10] sm:$0xff] %v525_v17  ;;  %v571_v19 = vmul.f32 %v525_v17, %v505_v13 }
 0x111   : > { %v1257_v20 = vpop.eup %1256 }
 0x112   : > { %v566_v21 = vadd.f32 1.0, %v1257_v20 }
 0x114   : > { %1258 = vrcp.f32 %v566_v21 }
 0x11e   : > { %v1259_v25 = vpop.eup %1258 }
 0x11f   : > { %v576_v26 = vrot.slane %v1259_v25, %v575_v24 }
 0x121   : > { %v579_v27 = vmul.f32 %v576_v26, %v571_v19  ;;  %v577_v28 = vmul.f32 %v576_v26, %v569_v6  ;;  %v578_v29 = vmul.f32 %v576_v26, %v570_v14  ;;  %v580_v30 = vmul.f32 %v576_v26, %v572_v63 }
 0x123   : > { %581 = vxpose.xlu1.b32.start [1/4] (short) %v577_v28, 128 }
 0x127   : > { %582 = vxpose.xlu1.b32.cont [2/4] (short) %v578_v29, 128 }
 0x12b   : > { %583 = vxpose.xlu1.b32.cont [3/4] (short) %v579_v27, 128 }
 0x12f   : > { %584 = vxpose.xlu1.b32.end [4/4] (short) %v580_v30, 128 }
 0x1a3   : > { %v597_v31 = vpop.trf.xlu1 }
 0x1a4   : > { %v613_v32 = vsel %vm388_vm1, %v597_v31, -inf }
 0x1a5   : > { %v614_v33 = vrot.slane %v613_v32, 4 }
 0x1a7   : > { %v615_v34 = vmax.f32 %v613_v32, %v614_v33  ;;  %v598_v35 = vpop.trf.xlu1 }
 0x1a8   : > { %v620_v36 = vsel %vm388_vm1, %v598_v35, -inf }
 0x1a9   : > { %v616_v37 = vrot.slane %v615_v34, 2  ;;  %v621_v38 = vrot.slane %v620_v36, 4 }
 0x1ab   : > { %v617_v39 = vmax.f32 %v615_v34, %v616_v37  ;;  %v622_v40 = vmax.f32 %v620_v36, %v621_v38  ;;  %v599_v41 = vpop.trf.xlu1 }
 0x1ac   : > { %v627_v42 = vsel %vm388_vm1, %v599_v41, -inf }
 0x1ad   : > { %v618_v43 = vrot.slane %v617_v39, 1  ;;  %v623_v44 = vrot.slane %v622_v40, 2  ;;  %v628_v45 = vrot.slane %v627_v42, 4 }
 0x1af   : > { %v619_v46 = vmax.f32 %v617_v39, %v618_v43  ;;  %v624_v47 = vmax.f32 %v622_v40, %v623_v44  ;;  %v629_v49 = vmax.f32 %v627_v42, %v628_v45  ;;  %v600_v50 = vpop.trf.xlu1 }
 0x1b0   : > { %v634_v51 = vsel %vm388_vm1, %v600_v50, -inf }
 0x1b1   : > { %v725_v53 = vsub.f32 %v597_v31, %v619_v46  ;;  %v625_v54 = vrot.slane %v624_v47, 1  ;;  %v630_v55 = vrot.slane %v629_v49, 2  ;;  %v635_v56 = vrot.slane %v634_v51, 4 }
 0x1b3   : > { %v741_v57 = vmul.f32 1.442695, %v725_v53  ;;  %v626_v59 = vmax.f32 %v624_v47, %v625_v54  ;;  %v631_v60 = vmax.f32 %v629_v49, %v630_v55  ;;  %v636_v61 = vmax.f32 %v634_v51, %v635_v56  ;;  %v601_v62 = vpop.trf.xlu1 }
 0x1b4   : > { %v641_v63 = vsel %vm388_vm1, %v601_v62, -inf }
 0x1b5   : > { %v726_v1 = vsub.f32 %v598_v35, %v626_v59  ;;  %v632_v2 = vrot.slane %v631_v60, 1  ;;  %v637_v3 = vrot.slane %v636_v61, 2  ;;  %1260 = vpow2.f32 %v741_v57 }
 0x1b6   : > { %v642_v4 = vrot.slane %v641_v63, 4 }
 0x1b7   : > { %v743_v5 = vmul.f32 1.442695, %v726_v1  ;;  %v633_v6 = vmax.f32 %v631_v60, %v632_v2  ;;  %v638_v7 = vmax.f32 %v636_v61, %v637_v3  ;;  %v602_v8 = vpop.trf.xlu1 }
 0x1b8   : > { %v643_v9 = vmax.f32 %v641_v63, %v642_v4  ;;  %v648_v10 = vsel %vm388_vm1, %v602_v8, -inf }
 0x1b9   : > { %1262 = vpow2.f32 %v743_v5  ;;  %v727_v11 = vsub.f32 %v599_v41, %v633_v6  ;;  %v639_v12 = vrot.slane %v638_v7, 1  ;;  %v649_v13 = vrot.slane %v648_v10, 4 }
 0x1ba   : > { %v644_v14 = vrot.slane %v643_v9, 2 }
 0x1bb   : > { %v745_v15 = vmul.f32 1.442695, %v727_v11  ;;  %v640_v16 = vmax.f32 %v638_v7, %v639_v12  ;;  %v650_v17 = vmax.f32 %v648_v10, %v649_v13  ;;  %v603_v18 = vpop.trf.xlu1 }
 0x1bc   : > { %v645_v19 = vmax.f32 %v643_v9, %v644_v14  ;;  %v655_v20 = vsel %vm388_vm1, %v603_v18, -inf }
 0x1bd   : > { %1264 = vpow2.f32 %v745_v15  ;;  %v728_v21 = vsub.f32 %v600_v50, %v640_v16  ;;  %v651_v22 = vrot.slane %v650_v17, 2  ;;  %v656_v23 = vrot.slane %v655_v20, 4 }
 0x1be   : > { %v646_v24 = vrot.slane %v645_v19, 1 }
 0x1bf   : > { %v747_v25 = vmul.f32 1.442695, %v728_v21  ;;  %v652_v26 = vmax.f32 %v650_v17, %v651_v22  ;;  %v657_v27 = vmax.f32 %v655_v20, %v656_v23  ;;  %v604_v28 = vpop.trf.xlu1  ;;  %v1555_v29 = vpop.eup %1260 }
 0x1c0   : > { %v647_v30 = vmax.f32 %v645_v19, %v646_v24  ;;  %v662_v31 = vsel %vm388_vm1, %v604_v28, -inf  ;;  %v773_v37 = vsel %vm388_vm1, %v1555_v29, 0.0 }
 0x1c1   : > { %1266 = vpow2.f32 %v747_v25  ;;  %v653_v32 = vrot.slane %v652_v26, 1  ;;  %v658_v33 = vrot.slane %v657_v27, 2  ;;  %v663_v35 = vrot.slane %v662_v31, 4 }
 0x1c2   : > { %v729_v34 = vsub.f32 %v601_v62, %v647_v30  ;;  %v774_v53 = vrot.slane %v773_v37, 4 }
 0x1c3   : > { %v1558_v36 = vpop.eup %1262  ;;  %v654_v38 = vmax.f32 %v652_v26, %v653_v32  ;;  %v659_v39 = vmax.f32 %v657_v27, %v658_v33  ;;  %v1562_v40 = vpop.trf.xlu1  ;;  %v664_v43 = vmax.f32 %v662_v31, %v663_v35 }
 0x1c4   : > { %v780_v41 = vsel %vm388_vm1, %v1558_v36, 0.0  ;;  %v749_v42 = vmul.f32 1.442695, %v729_v34  ;;  %v669_v44 = vsel %vm388_vm1, %v1562_v40, -inf  ;;  %v775_v6 = vadd.f32 %v774_v53, %v773_v37 }
 0x1c5   : > { %v781_v45 = vrot.slane %v780_v41, 4  ;;  %v730_v46 = vsub.f32 %v602_v8, %v654_v38  ;;  %v660_v47 = vrot.slane %v659_v39, 1  ;;  %v665_v49 = vrot.slane %v664_v43, 2 }
 0x1c6   : > { %1268 = vpow2.f32 %v749_v42  ;;  %v670_v50 = vrot.slane %v669_v44, 4  ;;  %v776_v19 = vrot.slane %v775_v6, 2 }
 0x1c7   : > { %v1568_v51 = vpop.eup %1264  ;;  %v751_v54 = vmul.f32 1.442695, %v730_v46  ;;  %v661_v55 = vmax.f32 %v659_v39, %v660_v47  ;;  %v1570_v56 = vpop.trf.xlu1  ;;  %v666_v59 = vmax.f32 %v664_v43, %v665_v49  ;;  %v782_v62 = vadd.f32 %v781_v45, %v780_v41 }
 0x1c8   : > { %v787_v57 = vsel %vm388_vm1, %v1568_v51, 0.0  ;;  %v671_v60 = vmax.f32 %v669_v44, %v670_v50  ;;  %v676_v61 = vsel %vm388_vm1, %v1570_v56, -inf  ;;  %v777_v43 = vadd.f32 %v776_v19, %v775_v6 }
 0x1c9   : > { %v788_v63 = vrot.slane %v787_v57, 4  ;;  %1270 = vpow2.f32 %v751_v54  ;;  %v731_v1 = vsub.f32 %v603_v18, %v661_v55  ;;  %v667_v2 = vrot.slane %v666_v59, 1 }
 0x1ca   : > { %v672_v3 = vrot.slane %v671_v60, 2  ;;  %v677_v4 = vrot.slane %v676_v61, 4  ;;  %v783_v13 = vrot.slane %v782_v62, 2 }
 0x1cb   : > { %v1576_v5 = vpop.eup %1266  ;;  %v753_v7 = vmul.f32 1.442695, %v731_v1  ;;  %v1578_v8 = vpop.trf.xlu1  ;;  %v668_v10 = vmax.f32 %v666_v59, %v667_v2  ;;  %v789_v14 = vadd.f32 %v788_v63, %v787_v57 }
 0x1cc   : > { %v794_v9 = vsel %vm388_vm1, %v1576_v5, 0.0  ;;  %v673_v11 = vmax.f32 %v671_v60, %v672_v3  ;;  %v678_v12 = vmax.f32 %v676_v61, %v677_v4  ;;  %v683_v18 = vsel %vm388_vm1, %v1578_v8, -inf }
 0x1cd   : > { %1272 = vpow2.f32 %v753_v7  ;;  %v732_v15 = vsub.f32 %v604_v28, %v668_v10  ;;  %v795_v20 = vrot.slane %v794_v9, 4  ;;  %v684_v21 = vrot.slane %v683_v18, 4 }
 0x1ce   : > { %v674_v16 = vrot.slane %v673_v11, 1  ;;  %v679_v17 = vrot.slane %v678_v12, 2  ;;  %v784_v30 = vadd.f32 %v783_v13, %v782_v62  ;;  %v790_v32 = vrot.slane %v789_v14, 2 }
 0x1cf   : > { %v1584_v22 = vpop.trf.xlu1  ;;  %v755_v24 = vmul.f32 1.442695, %v732_v15  ;;  %v685_v31 = vmax.f32 %v683_v18, %v684_v21  ;;  %v796_v37 = vadd.f32 %v795_v20, %v794_v9  ;;  %v778_v9 = vrot.slane %v777_v43, 1 }
 0x1d0   : > { %v1586_v23 = vpop.eup %1268  ;;  %v675_v25 = vmax.f32 %v673_v11, %v674_v16  ;;  %v680_v26 = vmax.f32 %v678_v12, %v679_v17  ;;  %v690_v27 = vsel %vm388_vm1, %v1584_v22, -inf  ;;  %v785_v47 = vrot.slane %v784_v30, 1 }
 0x1d1   : > { %v801_v28 = vsel %vm388_vm1, %v1586_v23, 0.0  ;;  %1274 = vpow2.f32 %v755_v24  ;;  %v686_v39 = vrot.slane %v685_v31, 2  ;;  %v691_v41 = vrot.slane %v690_v27, 4 }
 0x1d2   : > { %v733_v33 = vsub.f32 %v1562_v40, %v675_v25  ;;  %v681_v34 = vrot.slane %v680_v26, 1  ;;  %v802_v38 = vrot.slane %v801_v28, 4  ;;  %v791_v40 = vadd.f32 %v790_v32, %v789_v14 }
 0x1d3   : > { %v1593_v35 = vpop.eup %1270  ;;  %v1595_v42 = vpop.trf.xlu1  ;;  %v687_v50 = vmax.f32 %v685_v31, %v686_v39  ;;  %v692_v53 = vmax.f32 %v690_v27, %v691_v41  ;;  %v797_v59 = vrot.slane %v796_v37, 2  ;;  %v786_v10 = vadd.f32 %v785_v47, %v784_v30 }
 0x1d4   : > { %v808_v44 = vsel %vm388_vm1, %v1593_v35, 0.0  ;;  %v757_v45 = vmul.f32 1.442695, %v733_v33  ;;  %v682_v46 = vmax.f32 %v680_v26, %v681_v34  ;;  %v697_v55 = vsel %vm388_vm1, %v1595_v42, -inf }
 0x1d5   : > { %v809_v49 = vrot.slane %v808_v44, 4  ;;  %v803_v60 = vadd.f32 %v802_v38, %v801_v28  ;;  %v688_v61 = vrot.slane %v687_v50, 1  ;;  %v693_v62 = vrot.slane %v692_v53, 2 }
 0x1d6   : > { %1276 = vpow2.f32 %v757_v45  ;;  %v734_v54 = vsub.f32 %v1570_v56, %v682_v46  ;;  %v698_v4 = vrot.slane %v697_v55, 4  ;;  %v792_v13 = vrot.slane %v791_v40, 1 }
 0x1d7   : > { %v1602_v57 = vpop.eup %1272  ;;  %v1604_v63 = vpop.trf.xlu1  ;;  %v810_v1 = vadd.f32 %v809_v49, %v808_v44  ;;  %v689_v7 = vmax.f32 %v687_v50, %v688_v61  ;;  %v694_v56 = vmax.f32 %v692_v53, %v693_v62  ;;  %v798_v14 = vadd.f32 %v797_v59, %v796_v37 }
 0x1d8   : > { %v815_v2 = vsel %vm388_vm1, %v1602_v57, 0.0  ;;  %v759_v3 = vmul.f32 1.442695, %v734_v54  ;;  %v699_v11 = vmax.f32 %v697_v55, %v698_v4  ;;  %v704_v12 = vsel %vm388_vm1, %v1604_v63, -inf }
 0x1d9   : > { %v816_v6 = vrot.slane %v815_v2, 4  ;;  %v735_v15 = vsub.f32 %v1578_v8, %v689_v7  ;;  %v695_v16 = vrot.slane %v694_v56, 1  ;;  %v804_v18 = vrot.slane %v803_v60, 2 }
 0x1da   : > { %1278 = vpow2.f32 %v759_v3  ;;  %v811_v19 = vrot.slane %v810_v1, 2  ;;  %v700_v20 = vrot.slane %v699_v11, 2  ;;  %v705_v21 = vrot.slane %v704_v12, 4 }
 0x1db   : > { %v1611_v17 = vpop.eup %1274  ;;  %v1613_v24 = vpop.trf.xlu1  ;;  %v817_v25 = vadd.f32 %v816_v6, %v815_v2  ;;  %v761_v27 = vmul.f32 1.442695, %v735_v15  ;;  %v779_v30 = vadd.f32 %v778_v9, %v777_v43  ;;  %v696_v31 = vmax.f32 %v694_v56, %v695_v16 }
 0x1dc   : > { %v822_v26 = vsel %vm388_vm1, %v1611_v17, 0.0  ;;  %v701_v32 = vmax.f32 %v699_v11, %v700_v20  ;;  %v706_v33 = vmax.f32 %v704_v12, %v705_v21  ;;  %v793_v8 = vadd.f32 %v792_v13, %v791_v40 }
 0x1dd   : > { %v823_v28 = vrot.slane %v822_v26, 4  ;;  %v799_v34 = vrot.slane %v798_v14, 1  ;;  %1280 = vpow2.f32 %v761_v27  ;;  %v711_v37 = vsel %vm388_vm1, %v1613_v24, -inf }
 0x1de   : > { %v805_v39 = vadd.f32 %v804_v18, %v803_v60  ;;  %v736_v41 = vsub.f32 %v1584_v22, %v696_v31  ;;  %v702_v44 = vrot.slane %v701_v32, 1  ;;  %v707_v45 = vrot.slane %v706_v33, 2 }
 0x1df   : > { %v812_v46 = vadd.f32 %v811_v19, %v810_v1  ;;  %1282 = vrcp.f32 %v779_v30  ;;  %v712_v47 = vrot.slane %v711_v37, 4  ;;  %v818_v49 = vrot.slane %v817_v25, 2  ;;  %v1624_v54 = vpop.trf.xlu1 }
 0x1e0   : > { %v1619_v38 = vpop.eup %1276  ;;  %v824_v50 = vadd.f32 %v823_v28, %v822_v26  ;;  %v763_v53 = vmul.f32 1.442695, %v736_v41  ;;  %v703_v40 = vmax.f32 %v701_v32, %v702_v44  ;;  %v800_v55 = vadd.f32 %v799_v34, %v798_v14 }
 0x1e1   : > { %v829_v43 = vsel %vm388_vm1, %v1619_v38, 0.0  ;;  %v708_v59 = vmax.f32 %v706_v33, %v707_v45  ;;  %v713_v61 = vmax.f32 %v711_v37, %v712_v47  ;;  %1284 = vrcp.f32 %v786_v10 }
 0x1e2   : > { %v806_v22 = vrot.slane %v805_v39, 1  ;;  %v830_v62 = vrot.slane %v829_v43, 4  ;;  %1286 = vpow2.f32 %v763_v53  ;;  %v737_v1 = vsub.f32 %v1595_v42, %v703_v40 }
 0x1e3   : > { %v709_v3 = vrot.slane %v708_v59, 1  ;;  %v714_v4 = vrot.slane %v713_v61, 2  ;;  %v718_v6 = vsel %vm388_vm1, %v1624_v54, -inf  ;;  %v813_v7 = vrot.slane %v812_v46, 1 }
 0x1e4   : > { %v1626_v60 = vpop.eup %1278  ;;  %v819_v56 = vadd.f32 %v818_v49, %v817_v25  ;;  %v825_v9 = vrot.slane %v824_v50, 2  ;;  %v765_v11 = vmul.f32 1.442695, %v737_v1  ;;  %v719_v13 = vrot.slane %v718_v6, 4 }
 0x1e5   : > { %v836_v2 = vsel %vm388_vm1, %v1626_v60, 0.0  ;;  %v710_v10 = vmax.f32 %v708_v59, %v709_v3  ;;  %v715_v12 = vmax.f32 %v713_v61, %v714_v4  ;;  %1288 = vrcp.f32 %v793_v8 }
 0x1e6   : > { %v807_v14 = vadd.f32 %v806_v22, %v805_v39  ;;  %v831_v15 = vadd.f32 %v830_v62, %v829_v43  ;;  %v837_v16 = vrot.slane %v836_v2, 4  ;;  %1290 = vpow2.f32 %v765_v11 }
 0x1e7   : > { %v1633_v42 = vpop.eup %1280  ;;  %v738_v18 = vsub.f32 %v1604_v63, %v710_v10  ;;  %v716_v19 = vrot.slane %v715_v12, 1  ;;  %v720_v20 = vmax.f32 %v718_v6, %v719_v13  ;;  %1292 = vrcp.f32 %v800_v55 }
 0x1e8   : > { %v814_v21 = vadd.f32 %v813_v7, %v812_v46  ;;  %v820_v26 = vrot.slane %v819_v56, 1  ;;  %v843_v25 = vsel %vm388_vm1, %v1633_v42, 0.0  ;;  %v826_v30 = vadd.f32 %v825_v9, %v824_v50 }
 0x1e9   : > { %v1283_v27 = vpop.eup %1282  ;;  %v767_v28 = vmul.f32 1.442695, %v738_v18  ;;  %v717_v31 = vmax.f32 %v715_v12, %v716_v19  ;;  %v721_v32 = vrot.slane %v720_v20, 2  ;;  %v838_v33 = vadd.f32 %v837_v16, %v836_v2 }
 0x1ea   : > { %v844_v8 = vrot.slane %v843_v25, 4  ;;  %v901_v34 = vmul.f32 %v1283_v27, %v1555_v29  ;;  %1294 = vrcp.f32 %v807_v14  ;;  %v832_v63 = vrot.slane %v831_v15, 2 }
 0x1eb   : > { %v1285_v37 = vpop.eup %1284  ;;  %1296 = vpow2.f32 %v767_v28  ;;  %v739_v39 = vsub.f32 %v1613_v24, %v717_v31  ;;  %v722_v41 = vmax.f32 %v720_v20, %v721_v32  ;;  %v827_v46 = vrot.slane %v826_v30, 1 }
 0x1ec   : > { %v1640_v44 = vpop.eup %1286  ;;  %917 = vxpose.xlu0.b32.start [1/16] (narrow) %v901_v34, 32  ;;  %v902_v45 = vmul.f32 %v1285_v37, %v1558_v36  ;;  %v839_v50 = vrot.slane %v838_v33, 2  ;;  %v845_v29 = vadd.f32 %v844_v8, %v843_v25  ;;  %1298 = vrcp.f32 %v814_v21 }
 0x1ed   : > { %v850_v43 = vsel %vm388_vm1, %v1640_v44, 0.0  ;;  %v769_v47 = vmul.f32 1.442695, %v739_v39  ;;  %v723_v49 = vrot.slane %v722_v41, 1  ;;  %v821_v55 = vadd.f32 %v820_v26, %v819_v56 }
 0x1ee   : > { %v851_v53 = vrot.slane %v850_v43, 4  ;;  %v833_v59 = vadd.f32 %v832_v63, %v831_v15  ;;  %v828_v2 = vadd.f32 %v827_v46, %v826_v30  ;;  %v840_v3 = vadd.f32 %v839_v50, %v838_v33 }
 0x1ef   : > { %v1289_v40 = vpop.eup %1288  ;;  %1300 = vpow2.f32 %v769_v47  ;;  %v724_v24 = vmax.f32 %v722_v41, %v723_v49  ;;  %v846_v4 = vrot.slane %v845_v29, 2 }
 0x1f0   : > { %v1645_v61 = vpop.eup %1290  ;;  %918 = vxpose.xlu0.b32.cont [2/16] (narrow) %v902_v45, 32  ;;  %v903_v36 = vmul.f32 %v1289_v40, %v1568_v51  ;;  %v852_v6 = vadd.f32 %v851_v53, %v850_v43  ;;  %v834_v7 = vrot.slane %v833_v59, 1  ;;  %1302 = vrcp.f32 %v821_v55 }
 0x1f1   : > { %v1293_v22 = vpop.eup %1292  ;;  %v857_v62 = vsel %vm388_vm1, %v1645_v61, 0.0  ;;  %v740_v1 = vsub.f32 %v1624_v54, %v724_v24  ;;  %v841_v51 = vrot.slane %v840_v3, 1  ;;  %v847_v13 = vadd.f32 %v846_v4, %v845_v29 }
 0x1f2   : > { %v858_v56 = vrot.slane %v857_v62, 4  ;;  %v904_v10 = vmul.f32 %v1293_v22, %v1576_v5  ;;  %v853_v14 = vrot.slane %v852_v6, 2  ;;  %v835_v15 = vadd.f32 %v834_v7, %v833_v59 }
 0x1f3   : > { %v771_v9 = vmul.f32 1.442695, %v740_v1  ;;  %v842_v5 = vadd.f32 %v841_v51, %v840_v3  ;;  %v848_v26 = vrot.slane %v847_v13, 1 }
 0x1f4   : > { %v1295_v11 = vpop.eup %1294  ;;  %919 = vxpose.xlu0.b32.cont [3/16] (narrow) %v903_v36, 32  ;;  %v859_v16 = vadd.f32 %v858_v56, %v857_v62  ;;  %v854_v25 = vadd.f32 %v853_v14, %v852_v6 }
 0x1f5   : > { %v1652_v12 = vpop.eup %1296  ;;  %1304 = vpow2.f32 %v771_v9  ;;  %v905_v20 = vmul.f32 %v1295_v11, %v1586_v23  ;;  %v849_v8 = vadd.f32 %v848_v26, %v847_v13 }
 0x1f6   : > { %v864_v54 = vsel %vm388_vm1, %v1652_v12, 0.0  ;;  %1306 = vrcp.f32 %v828_v2  ;;  %v1299_v19 = vpop.eup %1298  ;;  %v860_v30 = vrot.slane %v859_v16, 2  ;;  %v855_v34 = vrot.slane %v854_v25, 1 }
 0x1f7   : > { %v865_v18 = vrot.slane %v864_v54, 4  ;;  %1308 = vrcp.f32 %v835_v15  ;;  %v906_v32 = vmul.f32 %v1299_v19, %v1593_v35  ;;  %v366_v15 = vpop.permute.xlu0 %365 }
 0x1f8   : > { %920 = vxpose.xlu0.b32.cont [4/16] (narrow) %v904_v10, 32  ;;  %v861_v23 = vadd.f32 %v860_v30, %v859_v16  ;;  %1310 = vrcp.f32 %v842_v5  ;;  %v856_v47 = vadd.f32 %v855_v34, %v854_v25  ;;  %v535_v19 = vadd.f32 %v1533_v48, %v366_v15 }
 0x1f9   : > { %v1657_v21 = vpop.eup %1300  ;;  %v866_v28 = vadd.f32 %v865_v18, %v864_v54  ;;  %1312 = vrcp.f32 %v849_v8 }
 0x1fa   : > { %v871_v27 = vsel %vm388_vm1, %v1657_v21, 0.0  ;;  %v1303_v33 = vpop.eup %1302  ;;  %v862_v49 = vrot.slane %v861_v23, 1  ;;  %1314 = vrcp.f32 %v856_v47 }
 0x1fb   : > { %v872_v31 = vrot.slane %v871_v27, 4  ;;  %v867_v63 = vrot.slane %v866_v28, 2  ;;  %v907_v45 = vmul.f32 %v1303_v33, %v1602_v57 }
 0x1fc   : > { %921 = vxpose.xlu0.b32.cont [5/16] (narrow) %v905_v20, 32  ;;  %v863_v55 = vadd.f32 %v862_v49, %v861_v23 }
 0x1fd   : > { %v873_v39 = vadd.f32 %v872_v31, %v871_v27  ;;  %v868_v50 = vadd.f32 %v867_v63, %v866_v28 }
 0x1fe   : > { %1316 = vrcp.f32 %v863_v55 }
 0x1ff   : > { %v1305_v37 = vpop.eup %1304  ;;  %v874_v35 = vrot.slane %v873_v39, 2  ;;  %v869_v59 = vrot.slane %v868_v50, 1 }
 0x200   : > { %v878_v41 = vsel %vm388_vm1, %v1305_v37, 0.0  ;;  %922 = vxpose.xlu0.b32.cont [6/16] (narrow) %v906_v32, 32  ;;  %v1307_v46 = vpop.eup %1306 }
 0x201   : > { %v879_v43 = vrot.slane %v878_v41, 4  ;;  %v908_v53 = vmul.f32 %v1307_v46, %v1611_v17  ;;  %v1309_v40 = vpop.eup %1308  ;;  %v875_v24 = vadd.f32 %v874_v35, %v873_v39  ;;  %v870_v62 = vadd.f32 %v869_v59, %v868_v50 }
 0x202   : > { %v909_v57 = vmul.f32 %v1309_v40, %v1619_v38  ;;  %v1311_v22 = vpop.eup %1310 }
 0x203   : > { %v880_v29 = vadd.f32 %v879_v43, %v878_v41  ;;  %v876_v1 = vrot.slane %v875_v24, 1  ;;  %v1313_v3 = vpop.eup %1312  ;;  %v910_v4 = vmul.f32 %v1311_v22, %v1626_v60  ;;  %1318 = vrcp.f32 %v870_v62 }
 0x204   : > { %923 = vxpose.xlu0.b32.cont [7/16] (narrow) %v907_v45, 32  ;;  %v1315_v7 = vpop.eup %1314  ;;  %v911_v56 = vmul.f32 %v1313_v3, %v1633_v42 }
 0x205   : > { %v881_v36 = vrot.slane %v880_v29, 2  ;;  %v877_v6 = vadd.f32 %v876_v1, %v875_v24  ;;  %v912_v38 = vmul.f32 %v1315_v7, %v1640_v44  ;;  %v371_v44 = vpop.permute.xlu0 %370 }
 0x206   : > { %v540_v20 = vadd.f32 %v1535_v52, %v371_v44 }
 0x207   : > { %v882_v2 = vadd.f32 %v881_v36, %v880_v29  ;;  %1320 = vrcp.f32 %v877_v6 }
 0x208   : > { %924 = vxpose.xlu0.b32.cont [8/16] (narrow) %v908_v53, 32  ;;  %v1317_v11 = vpop.eup %1316 }
 0x209   : > { %v883_v17 = vrot.slane %v882_v2, 1  ;;  %v913_v10 = vmul.f32 %v1317_v11, %v1645_v61  ;;  %v376_v16 = vpop.permute.xlu0 %375 }
 0x20a   : > { %v545_v26 = vadd.f32 %v1537_v58, %v376_v16 }
 0x20b   : > { %v884_v9 = vadd.f32 %v883_v17, %v882_v2 }
 0x20c   : > { %925 = vxpose.xlu0.b32.cont [9/16] (narrow) %v909_v57, 32 }
 0x20d   : > { %1322 = vrcp.f32 %v884_v9  ;;  %v1319_v51 = vpop.eup %1318  ;;  %v381_v18 = vpop.permute.xlu0 %380 }
 0x20e   : > { %v914_v60 = vmul.f32 %v1319_v51, %v1652_v12  ;;  %v550_v30 = vadd.f32 %v1539_v0, %v381_v18 }
 0x210   : > { %926 = vxpose.xlu0.b32.cont [10/16] (narrow) %v910_v4, 32 }
 0x211   : > { %v1321_v13 = vpop.eup %1320 }
 0x212   : > { %v915_v14 = vmul.f32 %v1321_v13, %v1657_v21 }
 0x214   : > { %927 = vxpose.xlu0.b32.cont [11/16] (narrow) %v911_v56, 32 }
 0x217   : > { %v1323_v42 = vpop.eup %1322 }
 0x218   : > { %928 = vxpose.xlu0.b32.cont [12/16] (narrow) %v912_v38, 32  ;;  %v916_v54 = vmul.f32 %v1323_v42, %v1305_v37 }
 0x21c   : > { %929 = vxpose.xlu0.b32.cont [13/16] (narrow) %v913_v10, 32 }
 0x220   : > { %930 = vxpose.xlu0.b32.cont [14/16] (narrow) %v914_v60, 32 }
 0x224   : > { %931 = vxpose.xlu0.b32.cont [15/16] (narrow) %v915_v14, 32 }
 0x228   : > { %932 = vxpose.xlu0.b32.end [16/16] (narrow) %v916_v54, 32 }
 0x26c   : > { %v933_v61 = vpop.trf.xlu0 }
 0x26d   : > { %v949_v12 = vmul.f32 %v933_v61, %v535_v19 }
 0x26f   : > { %953 = vst [vmem:[%s278_s25] sm:$0xff] %v949_v12 }
 0x270   : > { %v934_v21 = vpop.trf.xlu0 }
 0x271   : > { %v950_v5 = vmul.f32 %v934_v21, %v540_v20 }
 0x273   : > { %954 = vst [vmem:[%s278_s25 + $0x8] sm:$0xff] %v950_v5 }
 0x274   : > { %v935_v25 = vpop.trf.xlu0 }
 0x275   : > { %v951_v27 = vmul.f32 %v935_v25, %v545_v26 }
 0x277   : > { %955 = vst [vmem:[%s278_s25 + $0x10] sm:$0xff] %v951_v27 }
 0x278   : > { %v936_v48 = vpop.trf.xlu0 }
 0x279   : > { %v952_v28 = vmul.f32 %v936_v48, %v550_v30 }
 0x27b   : > { %956 = vst [vmem:[%s278_s25 + $0x18] sm:$0xff] %v952_v28 }
 0x27c PF: > { %s16_s20 = sadd.s32 1, %s1346_s20   ;;  %s1695_s18 = smov %s1342_s19 }
 0x27d   : > { %p13_p5 = scmp.ge.s32.totalorder %s16_s20, 4   ;;  %s1696_s19 = smov %s1698_s21 }
 0x27f   :  { %15 = sbr.rel (!%p13_p5) target bundleno = 2 (0x2), region = 86 }

</bundles_post_ra>
